<compile_context>
chip_gen: v5e
topology: v5e:2x2
jax: 0.10.0
libtpu: 0.0.40
codegen_flags: <defaults>
</compile_context>

<pallas_src>
import jax
import jax.numpy as jnp
from jax.experimental import pallas as pl
from jax.experimental.pallas import tpu as pltpu


LAYERS = [4] + 6 * [25] + [1]
NUM_LAYERS = len(LAYERS) - 1  # 7
PAD = 32                      # all feature dims padded to 32 (zero padding)


def _mlp_kernel(x_ref, w_ref, b_ref, o_ref):
    """x_ref: (PAD, block_n) f32, w_ref: (7, PAD, PAD) bf16,
    b_ref: (7, PAD, 1) f32, o_ref: (1, block_n) f32."""
    h = x_ref[...]  # (PAD, block_n) f32; padded feature rows are zero.

    # Hidden layers: tanh(W @ h + b). Zero-padded rows/cols stay exactly zero.
    for li in range(NUM_LAYERS - 1):
        z = (
            jnp.dot(w_ref[li], h.astype(jnp.bfloat16),
                    preferred_element_type=jnp.float32)
            + b_ref[li]
        )
        h = jnp.tanh(z)

    # Final linear layer: only output row 0 is real (out dim = 1).
    w_last = w_ref[NUM_LAYERS - 1]
    out = (
        jnp.dot(w_last[0:1, :], h.astype(jnp.bfloat16),
                preferred_element_type=jnp.float32)
        + b_ref[NUM_LAYERS - 1][0:1, :]
    )
    o_ref[...] = out.astype(o_ref.dtype)


def pack_params(weights, biases):
    """Pack PyTorch-style params (W_i: (out_i, in_i), b_i: (out_i,)) into one
    zero-padded bf16 weight tensor (7, PAD, PAD) and one f32 bias tensor
    (7, PAD, 1). Do this once; reuse across forward calls."""
    wp = jnp.zeros((NUM_LAYERS, PAD, PAD), jnp.float32)
    bp = jnp.zeros((NUM_LAYERS, PAD, 1), jnp.float32)
    for i, (w, b) in enumerate(zip(weights, biases)):
        wp = wp.at[i, : w.shape[0], : w.shape[1]].set(w)
        bp = bp.at[i, : b.shape[0], 0].set(b)
    return wp.astype(jnp.bfloat16), bp


def fcnn_forward(x, w_packed, b_packed, *, block_n=512):
    """x: (N, 4) float32. Returns (N, 1) float32."""
    n, d_in = x.shape
    assert d_in == LAYERS[0]
    assert block_n % 128 == 0, "batch tile must be lane-dense (multiple of 128)"

    # Pad batch to a multiple of block_n and transpose so batch is on lanes.
    n_pad = ((n + block_n - 1) // block_n) * block_n
    xt = jnp.zeros((PAD, n_pad), jnp.float32)
    xt = xt.at[:d_in, :n].set(x.T)

    grid = (n_pad // block_n,)

    x_spec = pl.BlockSpec((PAD, block_n), lambda i: (0, i))
    w_spec = pl.BlockSpec((NUM_LAYERS, PAD, PAD), lambda i: (0, 0, 0))
    b_spec = pl.BlockSpec((NUM_LAYERS, PAD, 1), lambda i: (0, 0, 0))
    out_spec = pl.BlockSpec((1, block_n), lambda i: (0, i))

    out = pl.pallas_call(
        _mlp_kernel,
        out_shape=jax.ShapeDtypeStruct((1, n_pad), jnp.float32),
        grid_spec=pltpu.PrefetchScalarGridSpec(
            num_scalar_prefetch=0,
            grid=grid,
            in_specs=[x_spec, w_spec, b_spec],
            out_specs=out_spec,
        ),
        compiler_params=pltpu.CompilerParams(
            dimension_semantics=("parallel",),
        ),
    )(xt, w_packed, b_packed)

    # Trim padding and return (N, 1) like the PyTorch module.
    return out[0, :n][:, None]


def init_params(key):
    """PyTorch nn.Linear-style init: W_i (out, in), b_i (out,), both
    U(-1/sqrt(fan_in), +1/sqrt(fan_in))."""
    weights, biases = [], []
    for i in range(NUM_LAYERS):
        fan_in, fan_out = LAYERS[i], LAYERS[i + 1]
        key, kw, kb = jax.random.split(key, 3)
        bound = 1.0 / float(jnp.sqrt(jnp.float32(fan_in)))
        w = jax.random.uniform(
            kw, (fan_out, fan_in), jnp.float32, minval=-bound, maxval=bound
        )
        b = jax.random.uniform(
            kb, (fan_out,), jnp.float32, minval=-bound, maxval=bound
        )
        weights.append(w)
        biases.append(b)
    return weights, biases


def fcnn_reference(x, weights, biases):
    """Pure-JAX f32 reference matching the PyTorch forward."""
    h = x
    for i in range(NUM_LAYERS - 1):
        h = jnp.tanh(h @ weights[i].T + biases[i])
    return h @ weights[-1].T + biases[-1]


if __name__ == "__main__":
    key = jax.random.PRNGKey(0)
    key, kx = jax.random.split(key)

    # Small example: ragged batch (exercises padding) with 2 grid steps so
    # both v7x TensorCores get work at block_n=256.
    batch = 300
    x = jax.random.uniform(kx, (batch, LAYERS[0]), jnp.float32,
                           minval=0.0, maxval=1.0)

    weights, biases = init_params(key)
    w_packed, b_packed = pack_params(weights, biases)

    out = fcnn_forward(x, w_packed, b_packed, block_n=256)
    out = jax.block_until_ready(out)

    ref = fcnn_reference(x, weights, biases)
    assert out.shape == (batch, 1), out.shape
    # bf16 MXU operands (f32 accumulation) -> relaxed tolerance vs f32 ref.
    assert jnp.allclose(out, ref, atol=5e-2, rtol=5e-2), (
        "mismatch vs reference: max abs diff = %s"
        % jnp.max(jnp.abs(out - ref))
    )

    print("KERNEL_OK")
</pallas_src>

<mosaic_0001>
module attributes {stable_mosaic.version = 11 : i64} {
  func.func @_mlp_kernel(%arg0: i32, %arg1: memref<32x256xf32, #tpu.memory_space<vmem>>, %arg2: memref<7x32x32xbf16, #tpu.memory_space<vmem>>, %arg3: memref<7x32x1xf32, #tpu.memory_space<vmem>>, %arg4: memref<1x256xf32, #tpu.memory_space<vmem>>) attributes {dimension_semantics = [#tpu.dimension_semantics<parallel>], iteration_bounds = array<i64: 2>, scalar_prefetch = 0 : i64, scratch_operands = 0 : i64, tpu.core_type = #tpu.core_type<tc>, window_params = [{transform_indices = @transform_0, window_bounds = array<i64: 32, 256>}, {pipeline_mode = #tpu.pipeline_mode<synchronous>, transform_indices = @transform_1, window_bounds = array<i64: 7, 32, 32>}, {pipeline_mode = #tpu.pipeline_mode<synchronous>, transform_indices = @transform_2, window_bounds = array<i64: 7, 32, 1>}, {transform_indices = @transform_3, window_bounds = array<i64: 1, 256>}]} {
    %c0 = arith.constant 0 : index
    %c0_0 = arith.constant 0 : index
    %0 = vector.load %arg1[%c0, %c0_0] : memref<32x256xf32, #tpu.memory_space<vmem>>, vector<32x256xf32>
    %c0_1 = arith.constant 0 : index
    %c0_2 = arith.constant 0 : index
    %c0_3 = arith.constant 0 : index
    %1 = vector.load %arg2[%c0_1, %c0_2, %c0_3] : memref<7x32x32xbf16, #tpu.memory_space<vmem>>, vector<1x32x32xbf16>
    %2 = vector.shape_cast %1 : vector<1x32x32xbf16> to vector<32x32xbf16>
    %3 = arith.truncf %0 : vector<32x256xf32> to vector<32x256xbf16>
    %cst = arith.constant dense<0.000000e+00> : vector<32x256xf32>
    %4 = tpu.matmul %2, %3, %cst {dimension_numbers = #tpu.dot_dimension_numbers<[1], [0], [0], [1], [0, 0, 1, 1], [], []>} : vector<32x32xbf16>, vector<32x256xbf16>, vector<32x256xf32> -> vector<32x256xf32>
    %c0_4 = arith.constant 0 : index
    %c0_5 = arith.constant 0 : index
    %c0_6 = arith.constant 0 : index
    %5 = vector.load %arg3[%c0_4, %c0_5, %c0_6] : memref<7x32x1xf32, #tpu.memory_space<vmem>>, vector<1x32x1xf32>
    %6 = vector.shape_cast %5 : vector<1x32x1xf32> to vector<32x1xf32>
    %7 = vector.broadcast %6 : vector<32x1xf32> to vector<32x256xf32>
    %8 = arith.addf %4, %7 : vector<32x256xf32>
    %9 = math.tanh %8 : vector<32x256xf32>
    %c1 = arith.constant 1 : index
    %c0_7 = arith.constant 0 : index
    %c0_8 = arith.constant 0 : index
    %10 = vector.load %arg2[%c1, %c0_7, %c0_8] : memref<7x32x32xbf16, #tpu.memory_space<vmem>>, vector<1x32x32xbf16>
    %11 = vector.shape_cast %10 : vector<1x32x32xbf16> to vector<32x32xbf16>
    %12 = arith.truncf %9 : vector<32x256xf32> to vector<32x256xbf16>
    %cst_9 = arith.constant dense<0.000000e+00> : vector<32x256xf32>
    %13 = tpu.matmul %11, %12, %cst_9 {dimension_numbers = #tpu.dot_dimension_numbers<[1], [0], [0], [1], [0, 0, 1, 1], [], []>} : vector<32x32xbf16>, vector<32x256xbf16>, vector<32x256xf32> -> vector<32x256xf32>
    %c1_10 = arith.constant 1 : index
    %c0_11 = arith.constant 0 : index
    %c0_12 = arith.constant 0 : index
    %14 = vector.load %arg3[%c1_10, %c0_11, %c0_12] : memref<7x32x1xf32, #tpu.memory_space<vmem>>, vector<1x32x1xf32>
    %15 = vector.shape_cast %14 : vector<1x32x1xf32> to vector<32x1xf32>
    %16 = vector.broadcast %15 : vector<32x1xf32> to vector<32x256xf32>
    %17 = arith.addf %13, %16 : vector<32x256xf32>
    %18 = math.tanh %17 : vector<32x256xf32>
    %c2 = arith.constant 2 : index
    %c0_13 = arith.constant 0 : index
    %c0_14 = arith.constant 0 : index
    %19 = vector.load %arg2[%c2, %c0_13, %c0_14] : memref<7x32x32xbf16, #tpu.memory_space<vmem>>, vector<1x32x32xbf16>
    %20 = vector.shape_cast %19 : vector<1x32x32xbf16> to vector<32x32xbf16>
    %21 = arith.truncf %18 : vector<32x256xf32> to vector<32x256xbf16>
    %cst_15 = arith.constant dense<0.000000e+00> : vector<32x256xf32>
    %22 = tpu.matmul %20, %21, %cst_15 {dimension_numbers = #tpu.dot_dimension_numbers<[1], [0], [0], [1], [0, 0, 1, 1], [], []>} : vector<32x32xbf16>, vector<32x256xbf16>, vector<32x256xf32> -> vector<32x256xf32>
    %c2_16 = arith.constant 2 : index
    %c0_17 = arith.constant 0 : index
    %c0_18 = arith.constant 0 : index
    %23 = vector.load %arg3[%c2_16, %c0_17, %c0_18] : memref<7x32x1xf32, #tpu.memory_space<vmem>>, vector<1x32x1xf32>
    %24 = vector.shape_cast %23 : vector<1x32x1xf32> to vector<32x1xf32>
    %25 = vector.broadcast %24 : vector<32x1xf32> to vector<32x256xf32>
    %26 = arith.addf %22, %25 : vector<32x256xf32>
    %27 = math.tanh %26 : vector<32x256xf32>
    %c3 = arith.constant 3 : index
    %c0_19 = arith.constant 0 : index
    %c0_20 = arith.constant 0 : index
    %28 = vector.load %arg2[%c3, %c0_19, %c0_20] : memref<7x32x32xbf16, #tpu.memory_space<vmem>>, vector<1x32x32xbf16>
    %29 = vector.shape_cast %28 : vector<1x32x32xbf16> to vector<32x32xbf16>
    %30 = arith.truncf %27 : vector<32x256xf32> to vector<32x256xbf16>
    %cst_21 = arith.constant dense<0.000000e+00> : vector<32x256xf32>
    %31 = tpu.matmul %29, %30, %cst_21 {dimension_numbers = #tpu.dot_dimension_numbers<[1], [0], [0], [1], [0, 0, 1, 1], [], []>} : vector<32x32xbf16>, vector<32x256xbf16>, vector<32x256xf32> -> vector<32x256xf32>
    %c3_22 = arith.constant 3 : index
    %c0_23 = arith.constant 0 : index
    %c0_24 = arith.constant 0 : index
    %32 = vector.load %arg3[%c3_22, %c0_23, %c0_24] : memref<7x32x1xf32, #tpu.memory_space<vmem>>, vector<1x32x1xf32>
    %33 = vector.shape_cast %32 : vector<1x32x1xf32> to vector<32x1xf32>
    %34 = vector.broadcast %33 : vector<32x1xf32> to vector<32x256xf32>
    %35 = arith.addf %31, %34 : vector<32x256xf32>
    %36 = math.tanh %35 : vector<32x256xf32>
    %c4 = arith.constant 4 : index
    %c0_25 = arith.constant 0 : index
    %c0_26 = arith.constant 0 : index
    %37 = vector.load %arg2[%c4, %c0_25, %c0_26] : memref<7x32x32xbf16, #tpu.memory_space<vmem>>, vector<1x32x32xbf16>
    %38 = vector.shape_cast %37 : vector<1x32x32xbf16> to vector<32x32xbf16>
    %39 = arith.truncf %36 : vector<32x256xf32> to vector<32x256xbf16>
    %cst_27 = arith.constant dense<0.000000e+00> : vector<32x256xf32>
    %40 = tpu.matmul %38, %39, %cst_27 {dimension_numbers = #tpu.dot_dimension_numbers<[1], [0], [0], [1], [0, 0, 1, 1], [], []>} : vector<32x32xbf16>, vector<32x256xbf16>, vector<32x256xf32> -> vector<32x256xf32>
    %c4_28 = arith.constant 4 : index
    %c0_29 = arith.constant 0 : index
    %c0_30 = arith.constant 0 : index
    %41 = vector.load %arg3[%c4_28, %c0_29, %c0_30] : memref<7x32x1xf32, #tpu.memory_space<vmem>>, vector<1x32x1xf32>
    %42 = vector.shape_cast %41 : vector<1x32x1xf32> to vector<32x1xf32>
    %43 = vector.broadcast %42 : vector<32x1xf32> to vector<32x256xf32>
    %44 = arith.addf %40, %43 : vector<32x256xf32>
    %45 = math.tanh %44 : vector<32x256xf32>
    %c5 = arith.constant 5 : index
    %c0_31 = arith.constant 0 : index
    %c0_32 = arith.constant 0 : index
    %46 = vector.load %arg2[%c5, %c0_31, %c0_32] : memref<7x32x32xbf16, #tpu.memory_space<vmem>>, vector<1x32x32xbf16>
    %47 = vector.shape_cast %46 : vector<1x32x32xbf16> to vector<32x32xbf16>
    %48 = arith.truncf %45 : vector<32x256xf32> to vector<32x256xbf16>
    %cst_33 = arith.constant dense<0.000000e+00> : vector<32x256xf32>
    %49 = tpu.matmul %47, %48, %cst_33 {dimension_numbers = #tpu.dot_dimension_numbers<[1], [0], [0], [1], [0, 0, 1, 1], [], []>} : vector<32x32xbf16>, vector<32x256xbf16>, vector<32x256xf32> -> vector<32x256xf32>
    %c5_34 = arith.constant 5 : index
    %c0_35 = arith.constant 0 : index
    %c0_36 = arith.constant 0 : index
    %50 = vector.load %arg3[%c5_34, %c0_35, %c0_36] : memref<7x32x1xf32, #tpu.memory_space<vmem>>, vector<1x32x1xf32>
    %51 = vector.shape_cast %50 : vector<1x32x1xf32> to vector<32x1xf32>
    %52 = vector.broadcast %51 : vector<32x1xf32> to vector<32x256xf32>
    %53 = arith.addf %49, %52 : vector<32x256xf32>
    %54 = math.tanh %53 : vector<32x256xf32>
    %c6 = arith.constant 6 : index
    %c0_37 = arith.constant 0 : index
    %c0_38 = arith.constant 0 : index
    %55 = vector.load %arg2[%c6, %c0_37, %c0_38] : memref<7x32x32xbf16, #tpu.memory_space<vmem>>, vector<1x32x32xbf16>
    %56 = vector.shape_cast %55 : vector<1x32x32xbf16> to vector<32x32xbf16>
    %57 = vector.extract_strided_slice %56 {offsets = [0, 0], sizes = [1, 32], strides = [1, 1]} : vector<32x32xbf16> to vector<1x32xbf16>
    %58 = arith.truncf %54 : vector<32x256xf32> to vector<32x256xbf16>
    %cst_39 = arith.constant dense<0.000000e+00> : vector<1x256xf32>
    %59 = tpu.matmul %57, %58, %cst_39 {dimension_numbers = #tpu.dot_dimension_numbers<[1], [0], [0], [1], [0, 0, 1, 1], [], []>} : vector<1x32xbf16>, vector<32x256xbf16>, vector<1x256xf32> -> vector<1x256xf32>
    %c6_40 = arith.constant 6 : index
    %c0_41 = arith.constant 0 : index
    %c0_42 = arith.constant 0 : index
    %60 = vector.load %arg3[%c6_40, %c0_41, %c0_42] : memref<7x32x1xf32, #tpu.memory_space<vmem>>, vector<1x32x1xf32>
    %61 = vector.shape_cast %60 : vector<1x32x1xf32> to vector<32x1xf32>
    %62 = vector.extract_strided_slice %61 {offsets = [0, 0], sizes = [1, 1], strides = [1, 1]} : vector<32x1xf32> to vector<1x1xf32>
    %63 = vector.broadcast %62 : vector<1x1xf32> to vector<1x256xf32>
    %64 = arith.addf %59, %63 : vector<1x256xf32>
    %c0_43 = arith.constant 0 : index
    %c0_44 = arith.constant 0 : index
    %65 = vector.load %arg4[%c0_43, %c0_44] : memref<1x256xf32, #tpu.memory_space<vmem>>, vector<1x256xf32>
    tpu.vector_store %arg4[%c0_43, %c0_44], %64 {strides = array<i32>} : memref<1x256xf32, #tpu.memory_space<vmem>>, vector<1x256xf32>,
    return
  }
  func.func @transform_0(%arg0: i32) -> (i32, i32) {
    %c0_i32 = arith.constant 0 : i32
    %c0_i32_0 = arith.constant 0 : i32
    return %c0_i32, %arg0 : i32, i32
  }
  func.func @transform_1(%arg0: i32) -> (i32, i32, i32) {
    %c0_i32 = arith.constant 0 : i32
    %c0_i32_0 = arith.constant 0 : i32
    %c0_i32_1 = arith.constant 0 : i32
    %c0_i32_2 = arith.constant 0 : i32
    return %c0_i32, %c0_i32_0, %c0_i32_1 : i32, i32, i32
  }
  func.func @transform_2(%arg0: i32) -> (i32, i32, i32) {
    %c0_i32 = arith.constant 0 : i32
    %c0_i32_0 = arith.constant 0 : i32
    %c0_i32_1 = arith.constant 0 : i32
    %c0_i32_2 = arith.constant 0 : i32
    return %c0_i32, %c0_i32_0, %c0_i32_1 : i32, i32, i32
  }
  func.func @transform_3(%arg0: i32) -> (i32, i32) {
    %c0_i32 = arith.constant 0 : i32
    %c0_i32_0 = arith.constant 0 : i32
    return %c0_i32, %arg0 : i32, i32
  }
}

</mosaic_0001>

<bundles_post_ra>
// kernel: tpu_custom_call.1
= control target key start
LH: loop header
LB: loop body
LE: loop exit
PB: predicated region body
PF: predicated region fallthrough
CT: control target
= control target key end

     0   :  { %8 = vsyncpa [#allocation4], 0  ;;  %s1569_s0 = inlined_call_operand.vmem [shape: f32[32,512], index: 0, kind: input, shape index: {}]   ;;  %s1570_s1 = inlined_call_operand.hbm [shape: bf16[7,32,32], index: 1, kind: input, shape index: {}]   ;;  %s1571_s2 = inlined_call_operand.vmem [shape: f32[7,32,1], index: 2, kind: input, shape index: {}]   ;;  %s1572_s3 = inlined_call_operand.hbm [shape: f32[1,512], index: 3, kind: output, shape index: {}]  }
   0x1   :  { %9 = vsyncpa [#allocation5], 0 }
   0x2   :  { %11 = vsyncpa [#allocation5 + $0x1], 0  ;;  %s1349_s12 = smov 0   ;;  %s1351_s13 = smov 0  }
   0x3   :  { %s1353_s14 = smov 0   ;;  %s1355_s15 = smov 0  }
   0x4 LB: > { %s1370_s16 = sadd.s32 4294967295, %s1323_s15   ;;  %s952_s17 = sadd.s32 4294967294, %s1323_s15   ;;  %s1323_s15 = sphi %s1355_s15, %s1580_s15   ;;  %s1319_s14 = sphi %s1353_s14, %s1579_s14   ;;  %s1315_s13 = sphi %s1351_s13, %s1578_s13   ;;  %s1311_s12 = sphi %s1349_s12, %s1577_s12  }
   0x5   : > { %s1374_s18 = sadd.s32 1, %s1323_s15   ;;  %s24_s19 = sadd.s32 1, %s1319_s14 }
   0x6   : > { %s21_s20 = ssub.s32 %s1323_s15, %s1374_s18  ;;  %p31_p0 = scmp.ne.s32.totalorder %s1319_s14, %s1315_s13 }
   0x7   : > { %p22_p1 = scmp.eq.s32.totalorder %s21_s20, 0  ;;  %p32_p2 = scmp.eq.s32.totalorder %s1323_s15, 0 }
   0x8   : > { %p103_p3 = scmp.eq.s32.totalorder %s1370_s16, 1  ;;  %p108_p4 = scmp.ne.s32.totalorder %s1315_s13, %s1311_s12 }
   0x9   : > { %s1386_s21 = scalar_select %p22_p1, %s1319_s14, %s24_s19  }
   0xa   : > { %p1388_p5 = por %p32_p2, %p31_p0  ;;  %p1392_p6 = por %p103_p3, %p31_p0 }
   0xb   : > { %p109_p7 = scmp.eq.s32.totalorder %s952_s17, 1  ;;  %p953_p8 = scmp.ge.s32.totalorder %s1323_s15, 1 }
   0xc   : > { %p116_p9 = scmp.lt.s32.totalorder %s1323_s15, 3  ;;  %p1089_p11 = scmp.eq.s32.totalorder %s1370_s16, 0 }
   0xd   : > { %p1398_p10 = por %p109_p7, %p108_p4  ;;  %s127_s28 = sshll.u32 %s1570_s1, 4  ;;  %s128_s28 = int_to_ptr.hbm [resolvable:$true] %s127_s28 }
   0xe   : > { %p1403_p12 = pnand %p953_p8, %p116_p9  ;;  %s1325_s29 = smov [#allocation3]  }
   0xf   : > { %s129_s30 = sshll.u32 %s1325_s29, 4  ;;  %s1326_s4 = smov 64   ;;  %s130_s30 = int_to_ptr.vmem [resolvable:$true] %s129_s30 }
  0x10   : > { %p1081_p13 = pneg %p1403_p12  ;;  %s1327_s5 = smov 4  }
  0x11   : > { %p955_p1 = scmp.ge.s32.totalorder %s1323_s15, 2 }
  0x12   : > { %p1082_p0 = pnand %p1089_p11, %p1081_p13 }
  0x13   : > { %142 = sbr.rel (%p955_p1) target bundleno = 36 (0x24), region = 24 }
  0x14   : > { %1084 = dma.hbm_to_vmem [thread:$0]  (!%p1082_p0), %s128_s28, 1792, %s130_s30, [#allocation4], %s1326_s4, %s1326_s4, %s1327_s5  }
  0x18   : > { %145 = sbr.rel (!%p1388_p5) target bundleno = 36 (0x24), region = 28  ;;  %s147_s6 = sand.u32 (%p1388_p5), 1, %s1319_s14  }
  0x19   : > { %s1062_s7 = sshll.u32 (%p1388_p5), %s1323_s15, 4  ;;  %s956_s8 = sshll.u32 (%p1388_p5), %s147_s6, 6 }
  0x1a   : > { %s152_s11 = scalar_lea.vmem (%p1388_p5), %s1569_s0, %s1062_s7  ;;  %s149_s17 = scalar_lea.vmem (%p1388_p5), [#allocation2], %s956_s8 }
  0x1b   : > { %v165_v0 = vld [vmem:[%s152_s11] sm:$0xff] (%p1388_p5)  ;;  %v167_v1 = vld [vmem:[%s152_s11 + $0x8] sm:$0xff] (%p1388_p5) }
  0x1c   : > { %v169_v2 = vld [vmem:[%s152_s11 + $0x20] sm:$0xff] (%p1388_p5)  ;;  %166 = vst [vmem:[%s149_s17] sm:$0xff] (%p1388_p5), %v165_v0  ;;  %v171_v3 = vld [vmem:[%s152_s11 + $0x28] sm:$0xff] (%p1388_p5) }
  0x1d   : > { %168 = vst [vmem:[%s149_s17 + $0x8] sm:$0xff] %v167_v1  ;;  %v173_v4 = vld [vmem:[%s152_s11 + $0x40] sm:$0xff]  ;;  %v175_v5 = vld [vmem:[%s152_s11 + $0x48] sm:$0xff] }
  0x1e   : > { %170 = vst [vmem:[%s149_s17 + $0x10] sm:$0xff] %v169_v2  ;;  %v177_v6 = vld [vmem:[%s152_s11 + $0x60] sm:$0xff]  ;;  %v179_v7 = vld [vmem:[%s152_s11 + $0x68] sm:$0xff] }
  0x1f   : > { %172 = vst [vmem:[%s149_s17 + $0x18] sm:$0xff] %v171_v3 }
  0x20   : > { %174 = vst [vmem:[%s149_s17 + $0x20] sm:$0xff] %v173_v4 }
  0x21   : > { %176 = vst [vmem:[%s149_s17 + $0x28] sm:$0xff] %v175_v5 }
  0x22   : > { %178 = vst [vmem:[%s149_s17 + $0x30] sm:$0xff] %v177_v6 }
  0x23   : > { %180 = vst [vmem:[%s149_s17 + $0x38] sm:$0xff] %v179_v7 }
  0x24 PF: > { %189 = sbr.rel (%p1403_p12) target bundleno = 1215 (0x4bf), region = 51  ;;  %s1427_s19 = sand.u32 (!%p1403_p12), 1, %s1315_s13  }
  0x25   : > { %s960_s20 = sshll.u32 (!%p1403_p12), %s1427_s19, 6 }
  0x26   : > { %s194_s22 = scalar_lea.vmem (!%p1403_p12), [#allocation2], %s960_s20 }
  0x29   : > { %1302 = dma.done.wait (%p1089_p11), [#allocation4], 1792  }
  0x2a   : > { %1304 = vsyncadd (%p1089_p11), [#allocation4], 4294965504  ;;  %v1328_v8 = vmov 0   ;;  %v241_v9 = vld [vmem:[%s1571_s2 + $0x10] sm:$0xff]  ;;  %v239_v10 = vld [vmem:[%s1571_s2] sm:$0xff]  ;;  %vm273_vm0 = vcmask 261120  }
  0x2b   : > { %1129 = vset.pattern.permute.xlu1 %v1328_v8  ;;  %1128 = vset.pattern.permute.xlu0 %v1328_v8  ;;  %v227_v11 = vld [vmem:[%s194_s22 + $0x20] sm:$0xff]  ;;  %v229_v12 = vld [vmem:[%s194_s22 + $0x30] sm:$0xff]  ;;  %v228_v13 = vld [vmem:[%s194_s22 + $0x28] sm:$0xff]  ;;  %s1059_s26 = sshll.u32 %s1370_s16, 1  ;;  %vm851_vm1 = vcmask 1040384   ;;  %s860_s16 = scalar_lea.sflag [#allocation5], %s1427_s19 }
  0x2c   : > { %1130 = vset.pattern.permute.xlu2 %v1328_v8  ;;  %255 = vperm.xlu0 %1128, %v241_v9   ;;  %v230_v14 = vld [vmem:[%s194_s22 + $0x38] sm:$0xff]  ;;  %v237_v15 = vpack.c.bf16 %v229_v12, %v227_v11  ;;  %v223_v17 = vld [vmem:[%s194_s22] sm:$0xff]  ;;  %v225_v18 = vld [vmem:[%s194_s22 + $0x10] sm:$0xff]  ;;  %s870_s28 = scalar_lea.hbm %s1572_s3, %s1059_s26  ;;  %s1277_s9 = scalar_lea.hbm %s1572_s3, 4 }
  0x2d   : > { %245 = vperm.xlu1 %1129, %v239_v10   ;;  %v238_v16 = vpack.c.bf16 %v230_v14, %v228_v13  ;;  %v224_v19 = vld [vmem:[%s194_s22 + $0x8] sm:$0xff]  ;;  %v226_v20 = vld [vmem:[%s194_s22 + $0x18] sm:$0xff]  ;;  %v235_v21 = vpack.c.bf16 %v225_v18, %v223_v17  ;;  %v1063_v25 = vld [vmem:[#allocation3] sm:$0xff]  ;;  %s962_s22 = sshll.u32 %s1427_s19, 1  ;;  %s874_s4 = sshll.u32 %s870_s28, 4  ;;  %s875_s4 = int_to_ptr.hbm [resolvable:$true] %s874_s4 }
  0x2e   : > { %286 = vmatpush.bf16.msra.mxu0 %v237_v15  ;;  %v236_v22 = vpack.c.bf16 %v226_v20, %v224_v19  ;;  %v242_v23 = vld [vmem:[%s1571_s2 + $0x18] sm:$0xff]  ;;  %v240_v24 = vld [vmem:[%s1571_s2 + $0x8] sm:$0xff]  ;;  %v975_v26 = vld [vmem:[%s1571_s2 + $0x20] sm:$0xff]  ;;  %s219_s29 = scalar_lea.vmem [#allocation6], %s962_s22  ;;  %s1271_s5 = sshra.s32 %s875_s4, 4  ;;  %s1272_s5 = int_to_ptr.hbm [resolvable:$true] %s1271_s5 }
  0x2f   : > { %305 = vmatpush.bf16.msra.mxu1 %v238_v16  ;;  %v976_v27 = vld [vmem:[%s1571_s2 + $0x28] sm:$0xff]  ;;  %v994_v28 = vld [vmem:[%s1571_s2 + $0x58] sm:$0xff]  ;;  %v991_v29 = vld [vmem:[%s1571_s2 + $0x40] sm:$0xff]  ;;  %s872_s30 = sshll.u32 %s219_s29, 4  ;;  %s1273_s6 = scalar_lea.hbm %s1272_s5, 2  ;;  %s873_s30 = int_to_ptr.vmem [resolvable:$true] %s872_s30 }
  0x30   : > { %v1064_v30 = vld [vmem:[#allocation3 + $0x8] sm:$0xff]  ;;  %v1009_v31 = vld [vmem:[%s1571_s2 + $0x70] sm:$0xff]  ;;  %v1010_v32 = vld [vmem:[%s1571_s2 + $0x78] sm:$0xff]  ;;  %p1274_p2 = scmp.ne.s32.totalorder %s1272_s5, %s1273_s6  ;;  %p1278_p5 = scmp.lt.s32.totalorder %s1272_s5, %s1572_s3 }
  0x31   : > { %v1008_v33 = vld [vmem:[%s1571_s2 + $0x68] sm:$0xff]  ;;  %v1025_v34 = vld [vmem:[%s1571_s2 + $0x90] sm:$0xff]  ;;  %v1023_v35 = vld [vmem:[%s1571_s2 + $0x80] sm:$0xff]  ;;  %p1279_p7 = scmp.lt.s32.totalorder %s1277_s9, %s1273_s6 }
  0x32   : > { %287 = vmatpush.bf16.msra.mxu0 %v235_v21  ;;  %v1024_v36 = vld [vmem:[%s1571_s2 + $0x88] sm:$0xff]  ;;  %v1042_v37 = vld [vmem:[%s1571_s2 + $0xb8] sm:$0xff]  ;;  %v1039_v38 = vld [vmem:[%s1571_s2 + $0xa0] sm:$0xff]  ;;  %p1275_p3 = pnand %p1274_p2, %p1392_p6 }
  0x33   : > { %306 = vmatpush.bf16.msra.mxu1 %v236_v22  ;;  %v1055_v39 = vld [vmem:[%s1571_s2 + $0xc0] sm:$0xff]  ;;  %v977_v44 = vld [vmem:[%s1571_s2 + $0x30] sm:$0xff]  ;;  %v978_v49 = vld [vmem:[%s1571_s2 + $0x38] sm:$0xff]  ;;  %p1280_p8 = por %p1279_p7, %p1278_p5 }
  0x34   : > { %260 = vperm.xlu0 %1128, %v242_v23   ;;  %352 = vperm.xlu2 %1130, %v977_v44   ;;  %v993_v62 = vld [vmem:[%s1571_s2 + $0x50] sm:$0xff]  ;;  %v992_v4 = vld [vmem:[%s1571_s2 + $0x48] sm:$0xff]  ;;  %v1007_v13 = vld [vmem:[%s1571_s2 + $0x60] sm:$0xff]  ;;  %p1276_p4 = pneg %p1275_p3 }
  0x35   : > { %250 = vperm.xlu1 %1129, %v240_v24   ;;  %971 = vmatmul.msk.bf16.vlgmr.msra.gmra.mxu0 %vm273_vm0, %v1063_v25  ;;  %v1065_v12 = vld [vmem:[#allocation3 + $0x10] sm:$0xff]  ;;  %v1026_v14 = vld [vmem:[%s1571_s2 + $0x98] sm:$0xff]  ;;  %v1040_v17 = vld [vmem:[%s1571_s2 + $0xa8] sm:$0xff] }
  0x36   : > { %973 = vmatmul.msk.bf16.vlgmr.msra.gmra.mxu1 %vm273_vm0, %v1063_v25  ;;  %v1066_v15 = vld [vmem:[#allocation3 + $0x18] sm:$0xff]  ;;  %v1041_v16 = vld [vmem:[%s1571_s2 + $0xb0] sm:$0xff]  ;;  %p1281_p9 = pnand %p1280_p8, %p1276_p4 }
  0x3c   : > { %342 = vperm.xlu0 %1128, %v975_v26   ;;  %357 = vperm.xlu2 %1130, %v978_v49  }
  0x3d   : > { %347 = vperm.xlu1 %1129, %v976_v27  }
  0x44   : > { %453 = vperm.xlu0 %1128, %v994_v28   ;;  %448 = vperm.xlu2 %1130, %v993_v62  }
  0x45   : > { %438 = vperm.xlu1 %1129, %v991_v29   ;;  %972 = vmatmul.msk.bf16.gmra.mxu0 %vm273_vm0, %v1064_v30 }
  0x46   : > { %974 = vmatmul.msk.bf16.gmra.mxu1 %vm273_vm0, %v1064_v30 }
  0x4c   : > { %544 = vperm.xlu0 %1128, %v1009_v31   ;;  %443 = vperm.xlu2 %1130, %v992_v4  }
  0x4d   : > { %549 = vperm.xlu1 %1129, %v1010_v32  }
  0x54   : > { %539 = vperm.xlu0 %1128, %v1008_v33   ;;  %534 = vperm.xlu2 %1130, %v1007_v13  }
  0x55   : > { %640 = vperm.xlu1 %1129, %v1025_v34  }
  0x5c   : > { %630 = vperm.xlu0 %1128, %v1023_v35   ;;  %645 = vperm.xlu2 %1130, %v1026_v14  }
  0x5d   : > { %635 = vperm.xlu1 %1129, %v1024_v36  }
  0x64   : > { %741 = vperm.xlu0 %1128, %v1042_v37   ;;  %736 = vperm.xlu2 %1130, %v1041_v16  }
  0x65   : > { %726 = vperm.xlu1 %1129, %v1039_v38  }
  0x6c   : > { %816 = vperm.xlu0 %1128, %v1055_v39   ;;  %731 = vperm.xlu2 %1130, %v1040_v17  }
  0x8e   : > { %v353_v22 = vpop.permute.xlu2 %352 }
  0x96   : > { %v358_v28 = vpop.permute.xlu2 %357 }
  0x9e   : > { %v256_v45 = vpop.permute.xlu0 %255 }
  0x9f   : > { %v246_v46 = vpop.permute.xlu1 %245 }
  0xa6   : > { %v261_v52 = vpop.permute.xlu0 %260 }
  0xa7   : > { %v251_v53 = vpop.permute.xlu1 %250 }
  0xae   : > { %v343_v33 = vpop.permute.xlu0 %342 }
  0xaf   : > { %v348_v27 = vpop.permute.xlu1 %347 }
  0xb2   : > { %v289_v40 = vpop.f32.mrf.mxu0 }
  0xb3   : > { %v308_v41 = vpop.f32.mrf.mxu1  ;;  %v290_v60 = vadd.f32 %v289_v40, %v246_v46 }
  0xb4   : > { %v309_v61 = vadd.f32 %v308_v41, %v246_v46 }
  0xba   : > { %v291_v42 = vpop.f32.mrf.mxu0 }
  0xbb   : > { %v310_v43 = vpop.f32.mrf.mxu1  ;;  %v292_v56 = vadd.f32 %v291_v42, %v251_v53 }
  0xbc   : > { %v311_v59 = vadd.f32 %v310_v43, %v251_v53 }
  0xc2   : > { %v294_v47 = vpop.f32.mrf.mxu0 }
  0xc3   : > { %v313_v48 = vpop.f32.mrf.mxu1  ;;  %v295_v50 = vadd.f32 %v294_v47, %v256_v45 }
  0xc4   : > { %v314_v51 = vadd.f32 %v313_v48, %v256_v45 }
  0xc5   : > { %1131 = vtanh.f32 %v295_v50  ;;  %v1067_v50 = vld [vmem:[#allocation3 + $0x20] sm:$0xff] }
  0xc6   : > { %1133 = vtanh.f32 %v314_v51  ;;  %v1068_v51 = vld [vmem:[#allocation3 + $0x28] sm:$0xff] }
  0xca   : > { %v296_v54 = vpop.f32.mrf.mxu0 }
  0xcb   : > { %v315_v55 = vpop.f32.mrf.mxu1  ;;  %v297_v57 = vadd.f32 %v296_v54, %v261_v52  ;;  %v1132_v63 = vpop.eup %1131 }
  0xcc   : > { %v316_v58 = vadd.f32 %v315_v55, %v261_v52  ;;  %v1134_v0 = vpop.eup %1133 }
  0xcd   : > { %1135 = vtanh.f32 %v297_v57 }
  0xce   : > { %1137 = vtanh.f32 %v316_v58 }
  0xcf   : > { %1139 = vtanh.f32 %v292_v56  ;;  %v449_v56 = vpop.permute.xlu2 %448 }
  0xd0   : > { %1141 = vtanh.f32 %v311_v59 }
  0xd1   : > { %1143 = vtanh.f32 %v290_v60 }
  0xd2   : > { %1145 = vtanh.f32 %v309_v61  ;;  %v454_v61 = vpop.permute.xlu0 %453 }
  0xd3   : > { %v1136_v1 = vpop.eup %1135 }
  0xd4   : > { %v1138_v2 = vpop.eup %1137  ;;  %v333_v3 = vpack.c.bf16 %v1136_v1, %v1132_v63 }
  0xd5   : > { %v1140_v5 = vpop.eup %1139  ;;  %v334_v6 = vpack.c.bf16 %v1138_v2, %v1134_v0 }
  0xd6   : > { %v1142_v7 = vpop.eup %1141  ;;  %382 = vmatpush.bf16.msra.mxu2 %v333_v3  ;;  %v439_v3 = vpop.permute.xlu1 %438 }
  0xd7   : > { %v1144_v8 = vpop.eup %1143  ;;  %401 = vmatpush.bf16.msra.mxu3 %v334_v6  ;;  %v444_v62 = vpop.permute.xlu2 %443 }
  0xd8   : > { %v1146_v9 = vpop.eup %1145  ;;  %v331_v10 = vpack.c.bf16 %v1140_v5, %v1144_v8 }
  0xd9   : > { %v332_v11 = vpack.c.bf16 %v1142_v7, %v1146_v9 }
  0xda   : > { %383 = vmatpush.bf16.msra.mxu2 %v331_v10 }
  0xdb   : > { %402 = vmatpush.bf16.msra.mxu3 %v332_v11 }
  0xdd   : > { %987 = vmatmul.msk.bf16.vlgmr.msra.gmra.mxu2 %vm273_vm0, %v1065_v12 }
  0xde   : > { %989 = vmatmul.msk.bf16.vlgmr.msra.gmra.mxu3 %vm273_vm0, %v1065_v12 }
  0xed   : > { %988 = vmatmul.msk.bf16.gmra.mxu2 %vm273_vm0, %v1066_v15 }
  0xee   : > { %990 = vmatmul.msk.bf16.gmra.mxu3 %vm273_vm0, %v1066_v15 }
 0x160   : > { %v385_v18 = vpop.f32.mrf.mxu2 }
 0x161   : > { %v404_v19 = vpop.f32.mrf.mxu3  ;;  %v386_v36 = vadd.f32 %v385_v18, %v343_v33 }
 0x162   : > { %v405_v37 = vadd.f32 %v404_v19, %v343_v33 }
 0x168   : > { %v387_v20 = vpop.f32.mrf.mxu2 }
 0x169   : > { %v406_v21 = vpop.f32.mrf.mxu3  ;;  %v388_v30 = vadd.f32 %v387_v20, %v348_v27  ;;  %v1069_v20 = vld [vmem:[#allocation3 + $0x30] sm:$0xff] }
 0x16a   : > { %v407_v34 = vadd.f32 %v406_v21, %v348_v27  ;;  %v1070_v21 = vld [vmem:[#allocation3 + $0x38] sm:$0xff] }
 0x170   : > { %v390_v23 = vpop.f32.mrf.mxu2 }
 0x171   : > { %v409_v24 = vpop.f32.mrf.mxu3  ;;  %v391_v25 = vadd.f32 %v390_v23, %v353_v22 }
 0x172   : > { %v410_v26 = vadd.f32 %v409_v24, %v353_v22 }
 0x173   : > { %1147 = vtanh.f32 %v391_v25 }
 0x174   : > { %1149 = vtanh.f32 %v410_v26  ;;  %v545_v26 = vpop.permute.xlu0 %544 }
 0x178   : > { %v392_v29 = vpop.f32.mrf.mxu2 }
 0x179   : > { %v393_v31 = vadd.f32 %v392_v29, %v358_v28  ;;  %v411_v32 = vpop.f32.mrf.mxu3  ;;  %v1148_v38 = vpop.eup %1147 }
 0x17a   : > { %v412_v35 = vadd.f32 %v411_v32, %v358_v28  ;;  %v1150_v39 = vpop.eup %1149 }
 0x17b   : > { %1151 = vtanh.f32 %v393_v31  ;;  %v550_v31 = vpop.permute.xlu1 %549 }
 0x17c   : > { %1153 = vtanh.f32 %v412_v35  ;;  %v540_v32 = vpop.permute.xlu0 %539 }
 0x17d   : > { %1155 = vtanh.f32 %v388_v30 }
 0x17e   : > { %1157 = vtanh.f32 %v407_v34 }
 0x17f   : > { %1159 = vtanh.f32 %v386_v36 }
 0x180   : > { %1161 = vtanh.f32 %v405_v37  ;;  %v535_v37 = vpop.permute.xlu2 %534 }
 0x181   : > { %v1152_v40 = vpop.eup %1151 }
 0x182   : > { %v1154_v41 = vpop.eup %1153  ;;  %v429_v42 = vpack.c.bf16 %v1152_v40, %v1148_v38 }
 0x183   : > { %v1156_v43 = vpop.eup %1155  ;;  %v430_v44 = vpack.c.bf16 %v1154_v41, %v1150_v39 }
 0x184   : > { %v1158_v45 = vpop.eup %1157  ;;  %478 = vmatpush.bf16.msrb.mxu0 %v429_v42 }
 0x185   : > { %v1160_v46 = vpop.eup %1159  ;;  %497 = vmatpush.bf16.msrb.mxu1 %v430_v44 }
 0x186   : > { %v1162_v47 = vpop.eup %1161  ;;  %v427_v48 = vpack.c.bf16 %v1156_v43, %v1160_v46 }
 0x187   : > { %v428_v49 = vpack.c.bf16 %v1158_v45, %v1162_v47 }
 0x188   : > { %479 = vmatpush.bf16.msrb.mxu0 %v427_v48 }
 0x189   : > { %498 = vmatpush.bf16.msrb.mxu1 %v428_v49 }
 0x18b   : > { %1003 = vmatmul.msk.bf16.vlgmr.msrb.gmra.mxu0 %vm273_vm0, %v1067_v50 }
 0x18c   : > { %1005 = vmatmul.msk.bf16.vlgmr.msrb.gmra.mxu1 %vm273_vm0, %v1067_v50 }
 0x19b   : > { %1004 = vmatmul.msk.bf16.gmra.mxu0 %vm273_vm0, %v1068_v51 }
 0x19c   : > { %1006 = vmatmul.msk.bf16.gmra.mxu1 %vm273_vm0, %v1068_v51 }
 0x208   : > { %v481_v52 = vpop.f32.mrf.mxu0 }
 0x209   : > { %v500_v53 = vpop.f32.mrf.mxu1  ;;  %v482_v6 = vadd.f32 %v481_v52, %v439_v3 }
 0x20a   : > { %v501_v7 = vadd.f32 %v500_v53, %v439_v3 }
 0x210   : > { %v483_v54 = vpop.f32.mrf.mxu0 }
 0x211   : > { %v502_v55 = vpop.f32.mrf.mxu1  ;;  %v484_v0 = vadd.f32 %v483_v54, %v444_v62  ;;  %v1071_v54 = vld [vmem:[#allocation3 + $0x40] sm:$0xff] }
 0x212   : > { %v503_v4 = vadd.f32 %v502_v55, %v444_v62  ;;  %v1072_v55 = vld [vmem:[#allocation3 + $0x48] sm:$0xff] }
 0x218   : > { %v486_v57 = vpop.f32.mrf.mxu0 }
 0x219   : > { %v505_v58 = vpop.f32.mrf.mxu1  ;;  %v487_v59 = vadd.f32 %v486_v57, %v449_v56 }
 0x21a   : > { %v506_v60 = vadd.f32 %v505_v58, %v449_v56 }
 0x21b   : > { %1163 = vtanh.f32 %v487_v59 }
 0x21c   : > { %1165 = vtanh.f32 %v506_v60  ;;  %v641_v60 = vpop.permute.xlu1 %640 }
 0x220   : > { %v488_v63 = vpop.f32.mrf.mxu0 }
 0x221   : > { %v489_v1 = vadd.f32 %v488_v63, %v454_v61  ;;  %v507_v2 = vpop.f32.mrf.mxu1  ;;  %v1164_v8 = vpop.eup %1163 }
 0x222   : > { %v508_v5 = vadd.f32 %v507_v2, %v454_v61  ;;  %v1166_v9 = vpop.eup %1165  ;;  %v646_v2 = vpop.permute.xlu2 %645 }
 0x223   : > { %1167 = vtanh.f32 %v489_v1 }
 0x224   : > { %1169 = vtanh.f32 %v508_v5  ;;  %v636_v1 = vpop.permute.xlu1 %635 }
 0x225   : > { %1171 = vtanh.f32 %v484_v0 }
 0x226   : > { %1173 = vtanh.f32 %v503_v4 }
 0x227   : > { %1175 = vtanh.f32 %v482_v6 }
 0x228   : > { %1177 = vtanh.f32 %v501_v7  ;;  %v631_v7 = vpop.permute.xlu0 %630 }
 0x229   : > { %v1168_v10 = vpop.eup %1167 }
 0x22a   : > { %v1170_v11 = vpop.eup %1169  ;;  %v525_v12 = vpack.c.bf16 %v1168_v10, %v1164_v8 }
 0x22b   : > { %v1172_v13 = vpop.eup %1171  ;;  %v526_v14 = vpack.c.bf16 %v1170_v11, %v1166_v9 }
 0x22c   : > { %v1174_v15 = vpop.eup %1173  ;;  %574 = vmatpush.bf16.msrb.mxu2 %v525_v12 }
 0x22d   : > { %v1176_v16 = vpop.eup %1175  ;;  %593 = vmatpush.bf16.msrb.mxu3 %v526_v14 }
 0x22e   : > { %v1178_v17 = vpop.eup %1177  ;;  %v523_v18 = vpack.c.bf16 %v1172_v13, %v1176_v16 }
 0x22f   : > { %v524_v19 = vpack.c.bf16 %v1174_v15, %v1178_v17 }
 0x230   : > { %575 = vmatpush.bf16.msrb.mxu2 %v523_v18 }
 0x231   : > { %594 = vmatpush.bf16.msrb.mxu3 %v524_v19 }
 0x233   : > { %1019 = vmatmul.msk.bf16.vlgmr.msrb.gmra.mxu2 %vm273_vm0, %v1069_v20 }
 0x234   : > { %1021 = vmatmul.msk.bf16.vlgmr.msrb.gmra.mxu3 %vm273_vm0, %v1069_v20 }
 0x243   : > { %1020 = vmatmul.msk.bf16.gmra.mxu2 %vm273_vm0, %v1070_v21 }
 0x244   : > { %1022 = vmatmul.msk.bf16.gmra.mxu3 %vm273_vm0, %v1070_v21 }
 0x2b6   : > { %v577_v22 = vpop.f32.mrf.mxu2 }
 0x2b7   : > { %v596_v23 = vpop.f32.mrf.mxu3  ;;  %v578_v40 = vadd.f32 %v577_v22, %v535_v37 }
 0x2b8   : > { %v597_v41 = vadd.f32 %v596_v23, %v535_v37 }
 0x2be   : > { %v579_v24 = vpop.f32.mrf.mxu2 }
 0x2bf   : > { %v598_v25 = vpop.f32.mrf.mxu3  ;;  %v580_v34 = vadd.f32 %v579_v24, %v540_v32  ;;  %v1073_v24 = vld [vmem:[#allocation3 + $0x50] sm:$0xff] }
 0x2c0   : > { %v599_v38 = vadd.f32 %v598_v25, %v540_v32  ;;  %v1074_v25 = vld [vmem:[#allocation3 + $0x58] sm:$0xff] }
 0x2c6   : > { %v582_v27 = vpop.f32.mrf.mxu2 }
 0x2c7   : > { %v601_v28 = vpop.f32.mrf.mxu3  ;;  %v583_v29 = vadd.f32 %v582_v27, %v545_v26 }
 0x2c8   : > { %v602_v30 = vadd.f32 %v601_v28, %v545_v26 }
 0x2c9   : > { %1179 = vtanh.f32 %v583_v29 }
 0x2ca   : > { %1181 = vtanh.f32 %v602_v30  ;;  %v737_v30 = vpop.permute.xlu2 %736 }
 0x2ce   : > { %v584_v33 = vpop.f32.mrf.mxu2 }
 0x2cf   : > { %v585_v35 = vadd.f32 %v584_v33, %v550_v31  ;;  %v603_v36 = vpop.f32.mrf.mxu3  ;;  %v1180_v42 = vpop.eup %1179 }
 0x2d0   : > { %v604_v39 = vadd.f32 %v603_v36, %v550_v31  ;;  %v1182_v43 = vpop.eup %1181 }
 0x2d1   : > { %1183 = vtanh.f32 %v585_v35  ;;  %v742_v35 = vpop.permute.xlu0 %741 }
 0x2d2   : > { %1185 = vtanh.f32 %v604_v39  ;;  %v732_v36 = vpop.permute.xlu2 %731 }
 0x2d3   : > { %1187 = vtanh.f32 %v580_v34 }
 0x2d4   : > { %1189 = vtanh.f32 %v599_v38 }
 0x2d5   : > { %1191 = vtanh.f32 %v578_v40 }
 0x2d6   : > { %1193 = vtanh.f32 %v597_v41  ;;  %v727_v41 = vpop.permute.xlu1 %726 }
 0x2d7   : > { %v1184_v44 = vpop.eup %1183 }
 0x2d8   : > { %v1186_v45 = vpop.eup %1185  ;;  %v621_v46 = vpack.c.bf16 %v1184_v44, %v1180_v42 }
 0x2d9   : > { %v1188_v47 = vpop.eup %1187  ;;  %v622_v48 = vpack.c.bf16 %v1186_v45, %v1182_v43 }
 0x2da   : > { %v1190_v49 = vpop.eup %1189  ;;  %670 = vmatpush.bf16.msra.mxu0 %v621_v46 }
 0x2db   : > { %v1192_v50 = vpop.eup %1191  ;;  %689 = vmatpush.bf16.msra.mxu1 %v622_v48 }
 0x2dc   : > { %v1194_v51 = vpop.eup %1193  ;;  %v619_v52 = vpack.c.bf16 %v1188_v47, %v1192_v50 }
 0x2dd   : > { %v620_v53 = vpack.c.bf16 %v1190_v49, %v1194_v51 }
 0x2de   : > { %671 = vmatpush.bf16.msra.mxu0 %v619_v52 }
 0x2df   : > { %690 = vmatpush.bf16.msra.mxu1 %v620_v53 }
 0x2e1   : > { %1035 = vmatmul.msk.bf16.vlgmr.msra.gmra.mxu0 %vm273_vm0, %v1071_v54 }
 0x2e2   : > { %1037 = vmatmul.msk.bf16.vlgmr.msra.gmra.mxu1 %vm273_vm0, %v1071_v54 }
 0x2f1   : > { %1036 = vmatmul.msk.bf16.gmra.mxu0 %vm273_vm0, %v1072_v55 }
 0x2f2   : > { %1038 = vmatmul.msk.bf16.gmra.mxu1 %vm273_vm0, %v1072_v55 }
 0x35e   : > { %v673_v56 = vpop.f32.mrf.mxu0 }
 0x35f   : > { %v692_v57 = vpop.f32.mrf.mxu1  ;;  %v674_v10 = vadd.f32 %v673_v56, %v631_v7 }
 0x360   : > { %v693_v11 = vadd.f32 %v692_v57, %v631_v7 }
 0x366   : > { %v675_v58 = vpop.f32.mrf.mxu0 }
 0x367   : > { %v694_v59 = vpop.f32.mrf.mxu1  ;;  %v676_v4 = vadd.f32 %v675_v58, %v636_v1  ;;  %v807_v58 = vld [vmem:[#allocation3 + $0x60] sm:$0xf] }
 0x368   : > { %v695_v8 = vadd.f32 %v694_v59, %v636_v1 }
 0x36e   : > { %v678_v61 = vpop.f32.mrf.mxu0 }
 0x36f   : > { %v697_v62 = vpop.f32.mrf.mxu1  ;;  %v679_v63 = vadd.f32 %v678_v61, %v641_v60  ;;  %v817_v61 = vpop.permute.xlu0 %816 }
 0x370   : > { %v698_v0 = vadd.f32 %v697_v62, %v641_v60  ;;  %v854_v60 = vlaneseq }
 0x371   : > { %1195 = vtanh.f32 %v679_v63 }
 0x372   : > { %1197 = vtanh.f32 %v698_v0  ;;  %vm856_vm2 = vcmp.lt.s32.totalorder %v854_v60, 256 }
 0x376   : > { %v680_v3 = vpop.f32.mrf.mxu0 }
 0x377   : > { %v681_v5 = vadd.f32 %v680_v3, %v646_v2  ;;  %v699_v6 = vpop.f32.mrf.mxu1  ;;  %v1196_v12 = vpop.eup %1195 }
 0x378   : > { %v700_v9 = vadd.f32 %v699_v6, %v646_v2  ;;  %v1198_v13 = vpop.eup %1197 }
 0x379   : > { %1199 = vtanh.f32 %v681_v5 }
 0x37a   : > { %1201 = vtanh.f32 %v700_v9 }
 0x37b   : > { %1203 = vtanh.f32 %v676_v4 }
 0x37c   : > { %1205 = vtanh.f32 %v695_v8 }
 0x37d   : > { %1207 = vtanh.f32 %v674_v10 }
 0x37e   : > { %1209 = vtanh.f32 %v693_v11 }
 0x37f   : > { %v1200_v14 = vpop.eup %1199 }
 0x380   : > { %v1202_v15 = vpop.eup %1201  ;;  %v717_v16 = vpack.c.bf16 %v1200_v14, %v1196_v12 }
 0x381   : > { %v1204_v17 = vpop.eup %1203  ;;  %v718_v18 = vpack.c.bf16 %v1202_v15, %v1198_v13 }
 0x382   : > { %v1206_v19 = vpop.eup %1205  ;;  %766 = vmatpush.bf16.msra.mxu2 %v717_v16 }
 0x383   : > { %v1208_v20 = vpop.eup %1207  ;;  %785 = vmatpush.bf16.msra.mxu3 %v718_v18 }
 0x384   : > { %v1210_v21 = vpop.eup %1209  ;;  %v715_v22 = vpack.c.bf16 %v1204_v17, %v1208_v20 }
 0x385   : > { %v716_v23 = vpack.c.bf16 %v1206_v19, %v1210_v21 }
 0x386   : > { %767 = vmatpush.bf16.msra.mxu2 %v715_v22 }
 0x387   : > { %786 = vmatpush.bf16.msra.mxu3 %v716_v23 }
 0x389   : > { %1051 = vmatmul.msk.bf16.vlgmr.msra.gmra.mxu2 %vm273_vm0, %v1073_v24 }
 0x38a   : > { %1053 = vmatmul.msk.bf16.vlgmr.msra.gmra.mxu3 %vm273_vm0, %v1073_v24 }
 0x399   : > { %1052 = vmatmul.msk.bf16.gmra.mxu2 %vm273_vm0, %v1074_v25 }
 0x39a   : > { %1054 = vmatmul.msk.bf16.gmra.mxu3 %vm273_vm0, %v1074_v25 }
 0x40c   : > { %v769_v26 = vpop.f32.mrf.mxu2 }
 0x40d   : > { %v788_v27 = vpop.f32.mrf.mxu3  ;;  %v770_v44 = vadd.f32 %v769_v26, %v727_v41 }
 0x40e   : > { %v789_v45 = vadd.f32 %v788_v27, %v727_v41 }
 0x414   : > { %v771_v28 = vpop.f32.mrf.mxu2 }
 0x415   : > { %v790_v29 = vpop.f32.mrf.mxu3  ;;  %v772_v38 = vadd.f32 %v771_v28, %v732_v36 }
 0x416   : > { %v791_v42 = vadd.f32 %v790_v29, %v732_v36 }
 0x41c   : > { %v774_v31 = vpop.f32.mrf.mxu2 }
 0x41d   : > { %v793_v32 = vpop.f32.mrf.mxu3  ;;  %v775_v33 = vadd.f32 %v774_v31, %v737_v30 }
 0x41e   : > { %v794_v34 = vadd.f32 %v793_v32, %v737_v30 }
 0x41f   : > { %1211 = vtanh.f32 %v775_v33 }
 0x420   : > { %1213 = vtanh.f32 %v794_v34 }
 0x424   : > { %v776_v37 = vpop.f32.mrf.mxu2 }
 0x425   : > { %v777_v39 = vadd.f32 %v776_v37, %v742_v35  ;;  %v795_v40 = vpop.f32.mrf.mxu3  ;;  %v1212_v46 = vpop.eup %1211 }
 0x426   : > { %v796_v43 = vadd.f32 %v795_v40, %v742_v35  ;;  %v1214_v47 = vpop.eup %1213 }
 0x427   : > { %1215 = vtanh.f32 %v777_v39 }
 0x428   : > { %1217 = vtanh.f32 %v796_v43 }
 0x429   : > { %1219 = vtanh.f32 %v772_v38 }
 0x42a   : > { %1221 = vtanh.f32 %v791_v42 }
 0x42b   : > { %1223 = vtanh.f32 %v770_v44 }
 0x42c   : > { %1225 = vtanh.f32 %v789_v45 }
 0x42d   : > { %v1216_v48 = vpop.eup %1215 }
 0x42e   : > { %v1218_v49 = vpop.eup %1217  ;;  %v810_v50 = vpack.c.bf16 %v1216_v48, %v1212_v46 }
 0x42f   : > { %v1220_v51 = vpop.eup %1219  ;;  %v811_v52 = vpack.c.bf16 %v1218_v49, %v1214_v47 }
 0x430   : > { %v1222_v53 = vpop.eup %1221  ;;  %828 = vmatpush.bf16.msrb.mxu0 %v810_v50 }
 0x431   : > { %v1224_v54 = vpop.eup %1223  ;;  %841 = vmatpush.bf16.msrb.mxu1 %v811_v52 }
 0x432   : > { %v1226_v55 = vpop.eup %1225  ;;  %v808_v56 = vpack.c.bf16 %v1220_v51, %v1224_v54 }
 0x433   : > { %v809_v57 = vpack.c.bf16 %v1222_v53, %v1226_v55 }
 0x434   : > { %829 = vmatpush.bf16.msrb.mxu0 %v808_v56 }
 0x435   : > { %842 = vmatpush.bf16.msrb.mxu1 %v809_v57 }
 0x437   : > { %1056 = vmatmul.msk.bf16.vlgmr.msrb.gmra.mxu0 %vm273_vm0, %v807_v58 }
 0x438   : > { %1057 = vmatmul.msk.bf16.vlgmr.msrb.gmra.mxu1 %vm273_vm0, %v807_v58 }
 0x4b4   : > { %v831_v59 = vpop.f32.mrf.mxu0 }
 0x4b5   : > { %v844_v62 = vpop.f32.mrf.mxu1  ;;  %v832_v0 = vadd.f32 %v831_v59, %v817_v61 }
 0x4b6   : > { %v845_v63 = vadd.f32 %v844_v62, %v817_v61 }
 0x4b8   : > { %v850_v1 = vrot.slane %v845_v63, 7 }
 0x4ba   : > { %v852_v2 = vsel %vm851_vm1, %v832_v0, %v850_v1 }
 0x4bb   : > { %858 = vst.msk [vmem:[%s219_s29] sm:$0x3] %vm856_vm2, %v852_v2 }
 0x4bc   : > { %v833_v3 = vpop.f32.mrf.mxu0 }
 0x4bd   : > { %1284 = shalt.err (!%p1281_p9)
}
 0x4be   : > { %1079 = dma.vmem_to_hbm [thread:$0]  (%p1392_p6), %s873_s30, 32, %s875_s4, %s860_s16   ;;  %v846_v4 = vpop.f32.mrf.mxu1 }
 0x4bf PF: > { %s886_s19 = sand.u32 1, %s1311_s12   ;;  %p1086_p11 = pnand %p955_p1, %p1398_p10 }
 0x4c0   : > { %s887_s17 = scalar_lea.sflag [#allocation5], %s886_s19 }
 0x4c1   : > { %p1087_p12 = pneg %p1086_p11 }
 0x4c3   : > { %1306 = dma.done.wait (%p1087_p12), %s887_s17, 32  }
 0x4c4   : > { %1308 = vsyncadd (%p1087_p12), %s887_s17, 4294967264  ;;  %p14_p13 = scmp.ge.s32.totalorder %s1374_s18, 4   ;;  %s1577_s12 = smov %s1315_s13 }
 0x4c5   : > { %s1578_s13 = smov %s1319_s14  ;;  %s1579_s14 = smov %s1386_s21 }
 0x4c6   : > { %s1580_s15 = smov %s1374_s18  ;;  %16 = sbr.rel (!%p14_p13) target bundleno = 4 (0x4), region = 112 }
 0x4cb   :  { %893 = vsyncpa [#allocation4], 1 }
 0x4cc   :  { %895 = vsyncpa [#allocation4 + $0x1], 1 }
 0x4cd   :  { %896 = vsyncpa [#allocation5], 1 }
 0x4ce   :  { %898 = vsyncpa [#allocation5 + $0x1], 1 }

</bundles_post_ra>
